<compile_context>
chip_gen: v7x
topology: tpu7x:2x2x1
jax: 0.10.0
libtpu: 0.0.40
codegen_flags: <defaults>
</compile_context>

<pallas_src>
import math

import jax
import jax.numpy as jnp
from jax import lax
from jax.experimental import pallas as pl
from jax.experimental.pallas import tpu as pltpu


_VMEM_LIMIT_BYTES = 48 * 1024 * 1024   # safe on v5e/v6e (128 MiB) and v7x (64 MiB)
_VMEM_TILE_BUDGET = 28 * 1024 * 1024   # per-step footprint target (double-buffer headroom)


# --------------------------------------------------------------------------
# kernel factory
# --------------------------------------------------------------------------
def _make_sdpa_kernel(has_mask, return_score, scale):
    """Kernel body for one (BHT, TQ) tile.

    Ref block shapes per grid step:
      q:     (BHT, TQ, D)
      k, v:  (BHT, L,  D)
      mask:  (1, TQ or 1, L)   [only if has_mask]
      o:     (BHT, TQ, D)
      score: (BHT, TQ, L)      [only if return_score]
    """

    def kernel(*refs):
        if has_mask:
            q_ref, k_ref, v_ref, m_ref = refs[:4]
            out_refs = refs[4:]
        else:
            q_ref, k_ref, v_ref = refs[:3]
            m_ref = None
            out_refs = refs[3:]
        o_ref = out_refs[0]
        s_ref = out_refs[1] if return_score else None

        q = q_ref[...]
        k = k_ref[...]
        v = v_ref[...]

        # q @ k^T without materializing k.T: contract the last dim of both.
        score = lax.dot_general(
            q, k,
            dimension_numbers=(((2,), (2,)), ((0,), (0,))),
            preferred_element_type=jnp.float32,
        )
        score = score * jnp.float32(scale)

        if has_mask:
            mvals = m_ref[...]  # (1, TQ or 1, L) -> broadcasts against (BHT, TQ, L)
            score = jnp.where(mvals == 0, jnp.float32(-10000.0), score)

        # numerically-stable softmax over the key axis (same math as nn.Softmax)
        m = jnp.max(score, axis=-1, keepdims=True)
        e = jnp.exp(score - m)
        # exact reciprocal keeps us within 1e-5 of the f32 reference
        # (switch to approx=True for a free EUP win if tolerance allows).
        p = e * pl.reciprocal(jnp.sum(e, axis=-1, keepdims=True), approx=False)

        if return_score:
            s_ref[...] = p.astype(s_ref.dtype)

        # p @ v -- MXU gets v's native dtype (bf16 stays bf16), f32 accumulate.
        o = lax.dot_general(
            p.astype(v.dtype), v,
            dimension_numbers=(((2,), (1,)), ((0,), (0,))),
            preferred_element_type=jnp.float32,
        )
        o_ref[...] = o.astype(o_ref.dtype)

    return kernel


# --------------------------------------------------------------------------
# tile selection
# --------------------------------------------------------------------------
def _select_tiles(BH, L, D, itemsize, has_mask, allow_bh_fuse, return_score):
    """Pick (BHT, TQ): batch*head fuse factor and query tile size."""
    if L <= 512:
        tq_cands = [L]
    else:
        tq_cands = [t for t in (512, 256, 128, 64, 32, 16, 8) if L % t == 0] or [L]
    if allow_bh_fuse:
        bht_cands = [b for b in (16, 8, 4, 2, 1) if b <= BH and BH % b == 0]
    else:
        bht_cands = [1]

    def footprint(bht, tq):
        nbuf = 2  # pipeline double-buffering
        b = nbuf * bht * tq * D * itemsize            # q in
        b += 2 * nbuf * bht * L * D * itemsize        # k, v in
        if has_mask:
            b += nbuf * tq * L * 4                    # mask (int32, shared block)
        b += nbuf * bht * tq * D * itemsize           # o out
        if return_score:
            b += nbuf * bht * tq * L * 4              # score out (f32)
        b += 4 * bht * tq * L * 4                     # f32 intermediates headroom
        return b

    for tq in tq_cands:            # prefer largest query tile...
        for bht in bht_cands:      # ...then largest head-fuse that still fits
            if footprint(bht, tq) <= _VMEM_TILE_BUDGET:
                return bht, tq
    return 1, tq_cands[-1]


# --------------------------------------------------------------------------
# wrapper
# --------------------------------------------------------------------------
def scale_dot_product_attention(q, k, v, mask=None, return_score=True):
    """Pallas implementation of ScaleDotProductAttention.forward.

    Args:
      q, k, v: (batch, head, length, d_tensor) arrays (same dtype).
      mask:    optional array broadcastable to (batch, head, length, length);
               positions where mask == 0 get score -10000 before softmax.
      return_score: if True (default, matches the PyTorch module) also return
               the (B, H, L, L) softmax probabilities.

    Returns:
      (out, score) if return_score else out.
    """
    B, H, L, D = q.shape
    BH = B * H
    qf = q.reshape(BH, L, D)
    kf = k.reshape(BH, L, D)
    vf = v.reshape(BH, L, D)
    itemsize = jnp.dtype(q.dtype).itemsize
    scale = 1.0 / math.sqrt(D)

    has_mask = mask is not None
    if has_mask:
        m = jnp.asarray(mask)
        if m.ndim < 4:
            m = m.reshape((1,) * (4 - m.ndim) + m.shape)
        Bm, Hm, Mq, Mk = m.shape
        if Bm not in (1, B) or Hm not in (1, H) or Mq not in (1, L) or Mk not in (1, L):
            raise ValueError(f"mask shape {m.shape} not broadcastable to {(B, H, L, L)}")
        if Mk != L:                              # broadcast only the (cheap) key axis
            m = jnp.broadcast_to(m, (Bm, Hm, Mq, L))
        mf = m.astype(jnp.int32).reshape(Bm * Hm, Mq, L)
        allow_bh_fuse = (Bm == 1 and Hm == 1)    # same mask block for every (b, h)
    else:
        Bm = Hm = Mq = 1
        mf = None
        allow_bh_fuse = True

    BHT, TQ = _select_tiles(BH, L, D, itemsize, has_mask, allow_bh_fuse, return_score)
    grid = (BH // BHT, L // TQ)

    q_spec = pl.BlockSpec((BHT, TQ, D), lambda i, j: (i, j, 0))
    kv_spec = pl.BlockSpec((BHT, L, D), lambda i, j: (i, 0, 0))
    o_spec = pl.BlockSpec((BHT, TQ, D), lambda i, j: (i, j, 0))
    s_spec = pl.BlockSpec((BHT, TQ, L), lambda i, j: (i, j, 0))

    in_specs = [q_spec, kv_spec, kv_spec]
    inputs = [qf, kf, vf]
    if has_mask:
        def mask_block_idx(i):
            # Reuse the same HBM mask block across batch/head instead of
            # materializing a broadcast (B, H, L, L) mask.
            b_idx = (i // H) if Bm > 1 else 0
            h_idx = (i % H) if Hm > 1 else 0
            return b_idx * Hm + h_idx

        if Mq == L:
            m_spec = pl.BlockSpec((1, TQ, L), lambda i, j: (mask_block_idx(i), j, 0))
        else:  # Mq == 1: single mask row, broadcast over the query tile in-kernel
            m_spec = pl.BlockSpec((1, 1, L), lambda i, j: (mask_block_idx(i), 0, 0))
        in_specs.append(m_spec)
        inputs.append(mf)

    if return_score:
        out_shape = (
            jax.ShapeDtypeStruct((BH, L, D), q.dtype),
            jax.ShapeDtypeStruct((BH, L, L), jnp.float32),
        )
        out_specs = [o_spec, s_spec]
    else:
        out_shape = jax.ShapeDtypeStruct((BH, L, D), q.dtype)
        out_specs = o_spec

    kernel = _make_sdpa_kernel(has_mask, return_score, scale)

    result = pl.pallas_call(
        kernel,
        out_shape=out_shape,
        grid_spec=pltpu.PrefetchScalarGridSpec(
            num_scalar_prefetch=0,
            grid=grid,
            in_specs=in_specs,
            out_specs=out_specs,
        ),
        compiler_params=pltpu.CompilerParams(
            dimension_semantics=("parallel", "parallel"),
            vmem_limit_bytes=_VMEM_LIMIT_BYTES,
        ),
    )(*inputs)

    if return_score:
        out, score = result
        return out.reshape(B, H, L, D), score.reshape(B, H, L, L)
    return result.reshape(B, H, L, D)


# --------------------------------------------------------------------------
# pure-JAX reference (mirrors the PyTorch module)
# --------------------------------------------------------------------------
def _reference(q, k, v, mask=None):
    d = q.shape[-1]
    score = jnp.einsum("bhqd,bhkd->bhqk", q, k) / math.sqrt(d)
    if mask is not None:
        score = jnp.where(mask == 0, -10000.0, score)
    score = jax.nn.softmax(score, axis=-1)
    out = jnp.einsum("bhqk,bhkd->bhqd", score, v)
    return out, score


if __name__ == "__main__":
    B, H, L, D = 2, 2, 8, 32
    key = jax.random.PRNGKey(0)
    kq, kk, kv = jax.random.split(key, 3)
    q = jax.random.normal(kq, (B, H, L, D), dtype=jnp.float32)
    k = jax.random.normal(kk, (B, H, L, D), dtype=jnp.float32)
    v = jax.random.normal(kv, (B, H, L, D), dtype=jnp.float32)

    # 1) no mask
    out, score = scale_dot_product_attention(q, k, v)
    jax.block_until_ready((out, score))
    ref_out, ref_score = _reference(q, k, v)
    assert jnp.allclose(out, ref_out, atol=1e-5, rtol=1e-5)
    assert jnp.allclose(score, ref_score, atol=1e-5, rtol=1e-5)

    # 2) shared causal mask (1, 1, L, L) -- one mask block reused for every (b, h)
    causal = jnp.tril(jnp.ones((L, L), dtype=jnp.int32))[None, None]
    out_m, score_m = scale_dot_product_attention(q, k, v, mask=causal)
    jax.block_until_ready((out_m, score_m))
    ref_out_m, ref_score_m = _reference(q, k, v, mask=causal)
    assert jnp.allclose(out_m, ref_out_m, atol=1e-5, rtol=1e-5)
    assert jnp.allclose(score_m, ref_score_m, atol=1e-5, rtol=1e-5)

    # 3) per-batch padding mask (B, 1, 1, L) -- exercises the index_map reuse path
    lengths = jnp.array([L - 2, L - 1])
    pad = (jnp.arange(L)[None, None, None, :]
           < lengths[:, None, None, None]).astype(jnp.int32)
    out_p, score_p = scale_dot_product_attention(q, k, v, mask=pad)
    jax.block_until_ready((out_p, score_p))
    ref_out_p, ref_score_p = _reference(q, k, v, mask=pad)
    assert jnp.allclose(out_p, ref_out_p, atol=1e-5, rtol=1e-5)
    assert jnp.allclose(score_p, ref_score_p, atol=1e-5, rtol=1e-5)

    # 4) score-free fast path (no O(L^2) HBM writeback)
    out_only = scale_dot_product_attention(q, k, v, mask=causal, return_score=False)
    out_only = jax.block_until_ready(out_only)
    assert jnp.allclose(out_only, ref_out_m, atol=1e-5, rtol=1e-5)

    print("KERNEL_OK")
</pallas_src>

<mosaic_0001>
module attributes {stable_mosaic.version = 11 : i64} {
  func.func @kernel(%arg0: i32, %arg1: i32, %arg2: memref<4x8x32xf32, #tpu.memory_space<vmem>>, %arg3: memref<4x8x32xf32, #tpu.memory_space<vmem>>, %arg4: memref<4x8x32xf32, #tpu.memory_space<vmem>>, %arg5: memref<4x8x32xf32, #tpu.memory_space<vmem>>, %arg6: memref<4x8x8xf32, #tpu.memory_space<vmem>>) attributes {dimension_semantics = [#tpu.dimension_semantics<parallel>, #tpu.dimension_semantics<parallel>], iteration_bounds = array<i64: 1, 1>, scalar_prefetch = 0 : i64, scratch_operands = 0 : i64, tpu.core_type = #tpu.core_type<tc>, window_params = [{transform_indices = @transform_0, window_bounds = array<i64: 4, 8, 32>}, {transform_indices = @transform_1, window_bounds = array<i64: 4, 8, 32>}, {transform_indices = @transform_2, window_bounds = array<i64: 4, 8, 32>}, {transform_indices = @transform_3, window_bounds = array<i64: 4, 8, 32>}, {transform_indices = @transform_4, window_bounds = array<i64: 4, 8, 8>}]} {
    %c0 = arith.constant 0 : index
    %c0_0 = arith.constant 0 : index
    %c0_1 = arith.constant 0 : index
    %0 = vector.load %arg2[%c0, %c0_0, %c0_1] : memref<4x8x32xf32, #tpu.memory_space<vmem>>, vector<4x8x32xf32>
    %c0_2 = arith.constant 0 : index
    %c0_3 = arith.constant 0 : index
    %c0_4 = arith.constant 0 : index
    %1 = vector.load %arg3[%c0_2, %c0_3, %c0_4] : memref<4x8x32xf32, #tpu.memory_space<vmem>>, vector<4x8x32xf32>
    %c0_5 = arith.constant 0 : index
    %c0_6 = arith.constant 0 : index
    %c0_7 = arith.constant 0 : index
    %2 = vector.load %arg4[%c0_5, %c0_6, %c0_7] : memref<4x8x32xf32, #tpu.memory_space<vmem>>, vector<4x8x32xf32>
    %cst = arith.constant dense<0.000000e+00> : vector<4x8x8xf32>
    %3 = tpu.matmul %0, %1, %cst {dimension_numbers = #tpu.dot_dimension_numbers<[2], [2], [1], [1], [0, 0, 0, 1, 1, 1], [0], [0]>} : vector<4x8x32xf32>, vector<4x8x32xf32>, vector<4x8x8xf32> -> vector<4x8x8xf32>
    %cst_8 = arith.constant 0.176776692 : f32
    %4 = vector.broadcast %cst_8 : f32 to vector<4x8x8xf32>
    %5 = arith.mulf %3, %4 : vector<4x8x8xf32>
    %cst_9 = arith.constant dense<0xFF800000> : vector<4x8xf32>
    %6 = vector.multi_reduction <maximumf>, %5, %cst_9 [2] : vector<4x8x8xf32> to vector<4x8xf32>
    %7 = vector.shape_cast %6 : vector<4x8xf32> to vector<4x8x1xf32>
    %8 = vector.broadcast %7 : vector<4x8x1xf32> to vector<4x8x8xf32>
    %9 = arith.subf %5, %8 : vector<4x8x8xf32>
    %10 = math.exp %9 : vector<4x8x8xf32>
    %cst_10 = arith.constant dense<0.000000e+00> : vector<4x8xf32>
    %11 = vector.multi_reduction <add>, %10, %cst_10 [2] : vector<4x8x8xf32> to vector<4x8xf32>
    %12 = vector.shape_cast %11 : vector<4x8xf32> to vector<4x8x1xf32>
    %13 = tpu.reciprocal %12 : vector<4x8x1xf32> -> vector<4x8x1xf32>
    %14 = vector.broadcast %13 : vector<4x8x1xf32> to vector<4x8x8xf32>
    %15 = arith.mulf %10, %14 : vector<4x8x8xf32>
    %c0_11 = arith.constant 0 : index
    %c0_12 = arith.constant 0 : index
    %c0_13 = arith.constant 0 : index
    %16 = vector.load %arg6[%c0_11, %c0_12, %c0_13] : memref<4x8x8xf32, #tpu.memory_space<vmem>>, vector<4x8x8xf32>
    tpu.vector_store %arg6[%c0_11, %c0_12, %c0_13], %15 {strides = array<i32>} : memref<4x8x8xf32, #tpu.memory_space<vmem>>, vector<4x8x8xf32>,
    %cst_14 = arith.constant dense<0.000000e+00> : vector<4x8x32xf32>
    %17 = tpu.matmul %15, %2, %cst_14 {dimension_numbers = #tpu.dot_dimension_numbers<[2], [1], [1], [2], [0, 0, 0, 1, 1, 2], [0], [0]>} : vector<4x8x8xf32>, vector<4x8x32xf32>, vector<4x8x32xf32> -> vector<4x8x32xf32>
    %c0_15 = arith.constant 0 : index
    %c0_16 = arith.constant 0 : index
    %c0_17 = arith.constant 0 : index
    %18 = vector.load %arg5[%c0_15, %c0_16, %c0_17] : memref<4x8x32xf32, #tpu.memory_space<vmem>>, vector<4x8x32xf32>
    tpu.vector_store %arg5[%c0_15, %c0_16, %c0_17], %17 {strides = array<i32>} : memref<4x8x32xf32, #tpu.memory_space<vmem>>, vector<4x8x32xf32>,
    return
  }
  func.func @transform_0(%arg0: i32, %arg1: i32) -> (i32, i32, i32) {
    %c0_i32 = arith.constant 0 : i32
    %c0_i32_0 = arith.constant 0 : i32
    return %arg0, %arg1, %c0_i32 : i32, i32, i32
  }
  func.func @transform_1(%arg0: i32, %arg1: i32) -> (i32, i32, i32) {
    %c0_i32 = arith.constant 0 : i32
    %c0_i32_0 = arith.constant 0 : i32
    %c0_i32_1 = arith.constant 0 : i32
    return %arg0, %c0_i32, %c0_i32_0 : i32, i32, i32
  }
  func.func @transform_2(%arg0: i32, %arg1: i32) -> (i32, i32, i32) {
    %c0_i32 = arith.constant 0 : i32
    %c0_i32_0 = arith.constant 0 : i32
    %c0_i32_1 = arith.constant 0 : i32
    return %arg0, %c0_i32, %c0_i32_0 : i32, i32, i32
  }
  func.func @transform_3(%arg0: i32, %arg1: i32) -> (i32, i32, i32) {
    %c0_i32 = arith.constant 0 : i32
    %c0_i32_0 = arith.constant 0 : i32
    return %arg0, %arg1, %c0_i32 : i32, i32, i32
  }
  func.func @transform_4(%arg0: i32, %arg1: i32) -> (i32, i32, i32) {
    %c0_i32 = arith.constant 0 : i32
    %c0_i32_0 = arith.constant 0 : i32
    return %arg0, %arg1, %c0_i32 : i32, i32, i32
  }
}

</mosaic_0001>

<bundles_post_ra>
// kernel: tpu_custom_call.1
= control target key start
LH: loop header
LB: loop body
LE: loop exit
PB: predicated region body
PF: predicated region fallthrough
CT: control target
= control target key end

     0   :  { %10 = vsyncpa [#allocation3], 0  ;;  %s1138_s0 = inlined_call_operand.hbm [shape: f32[4,8,32], index: 0, kind: input, shape index: {}]   ;;  %s1139_s1 = inlined_call_operand.hbm [shape: f32[4,8,32], index: 1, kind: input, shape index: {}]   ;;  %s1140_s2 = inlined_call_operand.hbm [shape: f32[4,8,32], index: 2, kind: input, shape index: {}]   ;;  %s1141_s3 = inlined_call_operand.hbm [shape: f32[4,8,32], index: 3, kind: output, shape index: {0}]   ;;  %s1142_s4 = inlined_call_operand.hbm [shape: f32[4,8,8], index: 4, kind: output, shape index: {1}]  }
   0x1   :  { %11 = vsyncpa [#allocation6], 0 }
   0x2   :  { %12 = vsyncpa [#allocation4], 0 }
   0x3   :  { %13 = vsyncpa [#allocation10], 0  ;;  %s970_s15 = smov [#allocation5]   ;;  %s971_s17 = smov [#allocation2]  }
   0x4   :  { %s31_s16 = sshll.u32 %s970_s15, 4  ;;  %s19_s18 = sshll.u32 %s971_s17, 4  ;;  %s32_s16 = int_to_ptr.vmem [resolvable:$true] %s31_s16  ;;  %s1004_s18 = int_to_ptr.vmem [resolvable:$true] %s19_s18 }
   0x5   :  { %s852_s21 = scalar_lea.hbm %s1139_s1, 512 }
   0x6   :  { %p853_p0 = scmp.ne.s32.totalorder %s1139_s1, %s852_s21  ;;  %p856_p1 = scmp.lt.u32.totalorder %s852_s21, %s1139_s1 }
   0x8   :  { %p858_p2 = pnand %p856_p1, %p853_p0 }
   0xa   :  { %861 = shalt.err (!%p858_p2)
}
   0xb   :  { %s862_s26 = scalar_lea.vmem %s32_s16, 512  ;;  %p867_p4 = scmp.lt.s32.totalorder %s32_s16, %s32_s16 }
   0xc   :  { %p863_p3 = scmp.ne.s32.totalorder %s32_s16, %s862_s26  ;;  %p868_p5 = scmp.lt.s32.totalorder %s862_s26, %s862_s26 }
   0xe   :  { %p869_p6 = por %p868_p5, %p867_p4 }
  0x10   :  { %p870_p7 = pnand %p869_p6, %p863_p3 }
  0x12   :  { %873 = shalt.err (!%p870_p7)
}
  0x13   :  { %s972_s27 = smov 128   ;;  %s973_s28 = smov 8  }
  0x14   :  { %37 = dma.hbm_to_vmem [thread:$0]  %s1139_s1, 512, %s32_s16, [#allocation6], %s972_s27, %s972_s27, %s973_s28  }
  0x15   :  { %s874_s7 = scalar_lea.hbm %s1138_s0, 512 }
  0x16   :  { %p875_p8 = scmp.ne.s32.totalorder %s1138_s0, %s874_s7  ;;  %p878_p9 = scmp.lt.u32.totalorder %s874_s7, %s1138_s0 }
  0x18   :  { %p880_p10 = pnand %p878_p9, %p875_p8 }
  0x1a   :  { %883 = shalt.err (!%p880_p10)
}
  0x1b   :  { %s884_s12 = scalar_lea.vmem %s1004_s18, 512  ;;  %p889_p12 = scmp.lt.s32.totalorder %s1004_s18, %s1004_s18 }
  0x1c   :  { %p885_p11 = scmp.ne.s32.totalorder %s1004_s18, %s884_s12  ;;  %p890_p13 = scmp.lt.s32.totalorder %s884_s12, %s884_s12 }
  0x1e   :  { %p891_p0 = por %p890_p13, %p889_p12 }
  0x20   :  { %p892_p1 = pnand %p891_p0, %p885_p11 }
  0x22   :  { %895 = shalt.err (!%p892_p1)
}
  0x23   :  { %25 = dma.hbm_to_vmem [thread:$0]  %s1138_s0, 512, %s1004_s18, [#allocation3], %s972_s27, %s972_s27, %s973_s28  }
  0x24   :  { %s974_s14 = smov [#allocation7]   ;;  %s896_s19 = scalar_lea.hbm %s1140_s2, 512 }
  0x25   :  { %s43_s15 = sshll.u32 %s974_s14, 4  ;;  %p897_p2 = scmp.ne.s32.totalorder %s1140_s2, %s896_s19  ;;  %s44_s15 = int_to_ptr.vmem [resolvable:$true] %s43_s15 }
  0x26   :  { %p900_p3 = scmp.lt.u32.totalorder %s896_s19, %s1140_s2 }
  0x28   :  { %p902_p4 = pnand %p900_p3, %p897_p2 }
  0x2a   :  { %905 = shalt.err (!%p902_p4)
}
  0x2b   :  { %s906_s24 = scalar_lea.vmem %s44_s15, 512  ;;  %p911_p6 = scmp.lt.s32.totalorder %s44_s15, %s44_s15 }
  0x2c   :  { %p907_p5 = scmp.ne.s32.totalorder %s44_s15, %s906_s24  ;;  %p912_p7 = scmp.lt.s32.totalorder %s906_s24, %s906_s24 }
  0x2e   :  { %p913_p8 = por %p912_p7, %p911_p6 }
  0x30   :  { %p914_p9 = pnand %p913_p8, %p907_p5 }
  0x32   :  { %917 = shalt.err (!%p914_p9)
}
  0x33   :  { %49 = dma.hbm_to_vmem [thread:$0]  %s1140_s2, 512, %s44_s15, [#allocation6], %s972_s27, %s972_s27, %s973_s28  }
  0x34   :  { %962 = dma.done.wait [#allocation3], 512  }
  0x35   :  { %963 = vsyncadd [#allocation3], 4294966784 }
  0x36   :  { %964 = dma.done.wait [#allocation6], 1024  }
  0x37   :  { %965 = vsyncadd [#allocation6], 4294966272  ;;  %v975_v0 = vmov 0.0   ;;  %vm976_vm0 = vmmov 0   ;;  %vm71_vm1 = vcmask 261120   ;;  %v63_v1 = vld [vmem:[#allocation5] sm:$0xff] }
  0x38   :  { %787 = vmatprep.subr.mxu0 %v975_v0  ;;  %789 = vmatprep.mubr.msk.f32.mxu0 %vm976_vm0, %v975_v0  ;;  %v64_v2 = vld [vmem:[#allocation5 + $0x8] sm:$0xff]  ;;  %v59_v3 = vld [vmem:[#allocation2] sm:$0xff]  ;;  %v65_v5 = vld [vmem:[#allocation5 + $0x10] sm:$0xff]  ;;  %vm380_vm2 = vcmask 64512   ;;  %s977_s2 = smov [#allocation9]  }
  0x39   :  { %792 = vmatprep.subr.mxu1 %v975_v0  ;;  %794 = vmatprep.mubr.msk.f32.mxu1 %vm976_vm0, %v975_v0  ;;  %v60_v4 = vld [vmem:[#allocation2 + $0x8] sm:$0xff]  ;;  %v66_v6 = vld [vmem:[#allocation5 + $0x18] sm:$0xff]  ;;  %v61_v7 = vld [vmem:[#allocation2 + $0x10] sm:$0xff]  ;;  %s742_s25 = sshll.u32 %s977_s2, 4  ;;  %s743_s25 = int_to_ptr.vmem [resolvable:$true] %s742_s25 }
  0x3a   :  { %788 = vmatpush3.xpose.msk.msra.mxu0 %vm71_vm1, %v63_v1  ;;  %793 = vmatpush3.xpose.msk.msra.mxu1 %vm71_vm1, %v64_v2  ;;  %v62_v8 = vld [vmem:[#allocation2 + $0x18] sm:$0xff]  ;;  %v67_v45 = vld [vmem:[#allocation7] sm:$0xff]  ;;  %v68_v46 = vld [vmem:[#allocation7 + $0x8] sm:$0xff]  ;;  %s918_s26 = scalar_lea.vmem %s743_s25, 512  ;;  %p923_p11 = scmp.lt.s32.totalorder %s743_s25, %s743_s25 }
  0x3b   :  { %797 = vmatprep.subr.mxu0 %v975_v0  ;;  %802 = vmatprep.subr.mxu1 %v975_v0  ;;  %v69_v53 = vld [vmem:[#allocation7 + $0x10] sm:$0xff]  ;;  %v70_v57 = vld [vmem:[#allocation7 + $0x18] sm:$0xff]  ;;  %p919_p10 = scmp.ne.s32.totalorder %s743_s25, %s918_s26  ;;  %p924_p12 = scmp.lt.s32.totalorder %s918_s26, %s918_s26 }
  0x3d   :  { %790 = vmatmul.mubr.msk.f32.vlgmr.msra.gmra.mrb[0].mxu0 %vm71_vm1, %v59_v3  ;;  %795 = vmatmul.mubr.msk.f32.vlgmr.msra.gmra.mrb[0].mxu1 %vm71_vm1, %v60_v4  ;;  %p925_p13 = por %p924_p12, %p923_p11 }
  0x3e   :  { %798 = vmatpush3.xpose.msk.msra.mxu0 %vm71_vm1, %v65_v5  ;;  %799 = vmatprep.mubr.msk.f32.mxu0 %vm976_vm0, %v975_v0 }
  0x3f   :  { %803 = vmatpush3.xpose.msk.msra.mxu1 %vm71_vm1, %v66_v6  ;;  %804 = vmatprep.mubr.msk.f32.mxu1 %vm976_vm0, %v975_v0  ;;  %p926_p0 = pnand %p925_p13, %p919_p10 }
  0x40   :  { %807 = vmatprep.subr.mxu0 %v975_v0  ;;  %812 = vmatprep.subr.mxu1 %v975_v0 }
  0x41   :  { %800 = vmatmul.mubr.msk.f32.vlgmr.msra.gmra.mrb[2].mxu0 %vm71_vm1, %v61_v7 }
  0x42   :  { %805 = vmatmul.mubr.msk.f32.vlgmr.msra.gmra.mrb[2].mxu1 %vm71_vm1, %v62_v8  ;;  %809 = vmatprep.mubr.msk.f32.mxu0 %vm976_vm0, %v975_v0 }
  0x43   :  { %814 = vmatprep.mubr.msk.f32.mxu1 %vm976_vm0, %v975_v0  ;;  %808 = vmatpush3.msra.mxu0 %v67_v45 }
  0x44   :  { %817 = vmatprep.subr.mxu0 %v975_v0  ;;  %813 = vmatpush3.msra.mxu1 %v68_v46 }
  0x45   :  { %822 = vmatprep.subr.mxu1 %v975_v0 }
 0x110   :  { %v144_v9 = vpop.f32.mrb[0].mxu0  ;;  %v220_v10 = vpop.f32.mrb[0].mxu1 }
 0x111   :  { %v376_v11 = vmul.f32 0.17677669, %v144_v9  ;;  %v791_v12 = vpop.f32.mrb[1].mxu0  ;;  %v377_v13 = vmul.f32 0.17677669, %v220_v10  ;;  %v796_v14 = vpop.f32.mrb[1].mxu1 }
 0x113   :  { %v381_v15 = vsel %vm380_vm2, %v376_v11, -inf  ;;  %v384_v20 = vsel %vm380_vm2, %v377_v13, -inf }
 0x114   :  { %382 = vmax.xlane.f32.xlu0 %v381_v15  ;;  %v296_v16 = vpop.f32.mrb[2].mxu0 }
 0x115   :  { %v378_v17 = vmul.f32 0.17677669, %v296_v16  ;;  %v801_v18 = vpop.f32.mrb[3].mxu0  ;;  %v372_v19 = vpop.f32.mrb[2].mxu1 }
 0x116   :  { %v379_v21 = vmul.f32 0.17677669, %v372_v19  ;;  %v806_v22 = vpop.f32.mrb[3].mxu1 }
 0x117   :  { %v387_v23 = vsel %vm380_vm2, %v378_v17, -inf }
 0x118   :  { %385 = vmax.xlane.f32.xlu0 %v384_v20  ;;  %388 = vmax.xlane.f32.xlu1 %v387_v23  ;;  %v390_v24 = vsel %vm380_vm2, %v379_v21, -inf }
 0x11c   :  { %391 = vmax.xlane.f32.xlu1 %v390_v24 }
 0x1a1   :  { %v383_v25 = vpop.xlane.xlu0 %382 }
 0x1a2   :  { %v393_v26 = vsub.f32 %v376_v11, %v383_v25 }
 0x1a4   :  { %v397_v27 = vmul.f32 1.442695, %v393_v26 }
 0x1a5   :  { %v386_v28 = vpop.xlane.xlu0 %385  ;;  %v389_v29 = vpop.xlane.xlu1 %388 }
 0x1a6   :  { %836 = vpow2.f32 %v397_v27  ;;  %v394_v30 = vsub.f32 %v377_v13, %v386_v28  ;;  %v395_v31 = vsub.f32 %v378_v17, %v389_v29 }
 0x1a8   :  { %v399_v32 = vmul.f32 1.442695, %v394_v30  ;;  %v401_v33 = vmul.f32 1.442695, %v395_v31 }
 0x1a9   :  { %v392_v34 = vpop.xlane.xlu1 %391 }
 0x1aa   :  { %838 = vpow2.f32 %v399_v32  ;;  %v396_v35 = vsub.f32 %v379_v21, %v392_v34 }
 0x1ab   :  { %840 = vpow2.f32 %v401_v33 }
 0x1ac   :  { %v403_v36 = vmul.f32 1.442695, %v396_v35 }
 0x1ae   :  { %842 = vpow2.f32 %v403_v36 }
 0x1b0   :  { %v837_v37 = vpop.eup %836 }
 0x1b1   :  { %v405_v38 = vsel %vm380_vm2, %v837_v37, 0.0 }
 0x1b2   :  { %406 = vadd.xlane.f32.xlu0 %v405_v38 }
 0x1b4   :  { %v839_v39 = vpop.eup %838 }
 0x1b5   :  { %v841_v40 = vpop.eup %840  ;;  %v408_v41 = vsel %vm380_vm2, %v839_v39, 0.0 }
 0x1b6   :  { %409 = vadd.xlane.f32.xlu1 %v408_v41  ;;  %v411_v42 = vsel %vm380_vm2, %v841_v40, 0.0 }
 0x1b7   :  { %412 = vadd.xlane.f32.xlu0 %v411_v42 }
 0x1b8   :  { %v843_v43 = vpop.eup %842 }
 0x1b9   :  { %v414_v44 = vsel %vm380_vm2, %v843_v43, 0.0 }
 0x1ba   :  { %415 = vadd.xlane.f32.xlu1 %v414_v44 }
 0x23f   :  { %v407_v47 = vpop.xlane.xlu0 %406 }
 0x240   :  { %844 = vrcp.f32 %v407_v47 }
 0x243   :  { %v410_v48 = vpop.xlane.xlu1 %409 }
 0x244   :  { %v413_v49 = vpop.xlane.xlu0 %412  ;;  %846 = vrcp.f32 %v410_v48 }
 0x245   :  { %848 = vrcp.f32 %v413_v49 }
 0x247   :  { %v416_v50 = vpop.xlane.xlu1 %415 }
 0x248   :  { %850 = vrcp.f32 %v416_v50 }
 0x24a   :  { %v845_v51 = vpop.eup %844 }
 0x24b   :  { %v421_v52 = vmul.f32 %v845_v51, %v837_v37 }
 0x24d   :  { %425 = vst.msk [vmem:[#allocation9] sm:$0xff] %vm380_vm2, %v421_v52  ;;  %810 = vmatmul.mubr.msk.f32.vlgmr.msra.gmra.mrb[4].mxu0 %vm380_vm2, %v421_v52 }
 0x24e   :  { %v847_v54 = vpop.eup %846  ;;  %818 = vmatpush3.msra.mxu0 %v69_v53  ;;  %819 = vmatprep.mubr.msk.f32.mxu0 %vm976_vm0, %v975_v0 }
 0x24f   :  { %v849_v55 = vpop.eup %848  ;;  %v422_v56 = vmul.f32 %v847_v54, %v839_v39 }
 0x250   :  { %v423_v58 = vmul.f32 %v849_v55, %v841_v40 }
 0x251   :  { %426 = vst.msk [vmem:[#allocation9 + $0x8] sm:$0xff] %vm380_vm2, %v422_v56  ;;  %815 = vmatmul.mubr.msk.f32.vlgmr.msra.gmra.mrb[4].mxu1 %vm380_vm2, %v422_v56 }
 0x252   :  { %v851_v59 = vpop.eup %850  ;;  %427 = vst.msk [vmem:[#allocation9 + $0x10] sm:$0xff] %vm380_vm2, %v423_v58  ;;  %820 = vmatmul.mubr.msk.f32.vlgmr.msra.gmra.mrb[6].mxu0 %vm380_vm2, %v423_v58  ;;  %823 = vmatpush3.msra.mxu1 %v70_v57 }
 0x253   :  { %v424_v60 = vmul.f32 %v851_v59, %v843_v43  ;;  %824 = vmatprep.mubr.msk.f32.mxu1 %vm976_vm0, %v975_v0 }
 0x255   :  { %428 = vst.msk [vmem:[#allocation9 + $0x18] sm:$0xff] %vm380_vm2, %v424_v60  ;;  %825 = vmatmul.mubr.msk.f32.vlgmr.msra.gmra.mrb[6].mxu1 %vm380_vm2, %v424_v60 }
 0x256   :  { %929 = shalt.err (!%p926_p0)
}
 0x257   :  { %s930_s5 = scalar_lea.hbm %s1142_s4, 512 }
 0x258   :  { %p931_p1 = scmp.ne.s32.totalorder %s1142_s4, %s930_s5  ;;  %p934_p2 = scmp.lt.u32.totalorder %s930_s5, %s1142_s4 }
 0x25a   :  { %p936_p3 = pnand %p934_p2, %p931_p1 }
 0x25c   :  { %939 = shalt.err (!%p936_p3)
}
 0x25d   :  { %748 = dma.vmem_to_hbm [thread:$0]  %s743_s25, 512, %s1142_s4, [#allocation10], %s972_s27, %s972_s27, %s973_s28  }
 0x25e   :  { %s978_s12 = smov [#allocation8]  }
 0x25f   :  { %s730_s1 = sshll.u32 %s978_s12, 4  ;;  %s731_s1 = int_to_ptr.vmem [resolvable:$true] %s730_s1 }
 0x260   :  { %s940_s4 = scalar_lea.vmem %s731_s1, 512  ;;  %p945_p5 = scmp.lt.s32.totalorder %s731_s1, %s731_s1 }
 0x261   :  { %p941_p4 = scmp.ne.s32.totalorder %s731_s1, %s940_s4  ;;  %p946_p6 = scmp.lt.s32.totalorder %s940_s4, %s940_s4 }
 0x263   :  { %p947_p7 = por %p946_p6, %p945_p5 }
 0x265   :  { %p948_p8 = pnand %p947_p7, %p941_p4 }
 0x320   :  { %v498_v61 = vpop.f32.mrb[4].mxu0 }
 0x321   :  { %721 = vst.msk [vmem:[#allocation8] sm:$0xff] %vm71_vm1, %v498_v61  ;;  %v811_v62 = vpop.f32.mrb[5].mxu0 }
 0x324   :  { %v571_v63 = vpop.f32.mrb[4].mxu1 }
 0x325   :  { %722 = vst.msk [vmem:[#allocation8 + $0x8] sm:$0xff] %vm71_vm1, %v571_v63  ;;  %v644_v0 = vpop.f32.mrb[6].mxu0  ;;  %v816_v1 = vpop.f32.mrb[5].mxu1 }
 0x326   :  { %723 = vst.msk [vmem:[#allocation8 + $0x10] sm:$0xff] %vm71_vm1, %v644_v0  ;;  %v821_v2 = vpop.f32.mrb[7].mxu0 }
 0x328   :  { %v717_v3 = vpop.f32.mrb[6].mxu1 }
 0x329   :  { %724 = vst.msk [vmem:[#allocation8 + $0x18] sm:$0xff] %vm71_vm1, %v717_v3  ;;  %v826_v4 = vpop.f32.mrb[7].mxu1 }
 0x32a   :  { %951 = shalt.err (!%p948_p8)
}
 0x32b   :  { %s952_s15 = scalar_lea.hbm %s1141_s3, 512 }
 0x32c   :  { %p953_p9 = scmp.ne.s32.totalorder %s1141_s3, %s952_s15  ;;  %p956_p10 = scmp.lt.u32.totalorder %s952_s15, %s1141_s3 }
 0x32e   :  { %p958_p11 = pnand %p956_p10, %p953_p9 }
 0x330   :  { %961 = shalt.err (!%p958_p11)
}
 0x331   :  { %736 = dma.vmem_to_hbm [thread:$0]  %s731_s1, 512, %s1141_s3, [#allocation4], %s972_s27, %s972_s27, %s973_s28  }
 0x332   :  { %966 = dma.done.wait [#allocation4], 512  }
 0x333   :  { %967 = vsyncadd [#allocation4], 4294966784 }
 0x334   :  { %968 = dma.done.wait [#allocation10], 512  }
 0x335   :  { %969 = vsyncadd [#allocation10], 4294966784 }
 0x336   :  { %755 = vsyncpa [#allocation3], 1 }
 0x337   :  { %756 = vsyncpa [#allocation6], 1 }
 0x338   :  { %757 = vsyncpa [#allocation4], 1 }
 0x339   :  { %758 = vsyncpa [#allocation10], 1 }

</bundles_post_ra>
